<compile_context>
chip_gen: v6e
topology: v6e:2x2x1
jax: 0.10.0
libtpu: 0.0.40
codegen_flags: <defaults>
</compile_context>

<pallas_src>
from functools import partial

import jax
import jax.numpy as jnp
from jax import lax
from jax.experimental import pallas as pl
from jax.experimental.pallas import tpu as pltpu


# ----------------------------- small host-side helpers ------------------------------

def _round_up(x, m):
    return ((x + m - 1) // m) * m


def _device_kind():
    try:
        return jax.devices()[0].device_kind.lower()
    except Exception:
        return ""


def _auto_exp_in_bf16():
    # bf16 EUP exists on v6e / v7x; keep f32 exp on v5e and older.
    kind = _device_kind()
    return ("v6" in kind) or ("v7" in kind)


def _vmem_limit_bytes():
    # Generation-aware VMEM request: ~65% of physical capacity, capped at 100 MiB.
    try:
        cap = int(pltpu.get_tpu_info().vmem_capacity_bytes)
    except Exception:
        cap = 128 * 1024 * 1024
    return max(32 * 1024 * 1024, min(100 * 1024 * 1024, (cap * 13) // 20))


# --------------------------------- Pallas kernels -----------------------------------

def _kv_proj_kernel(x2_ref, wkv_ref, bkv_ref, k_ref, vt_ref, *, channels, head, head_dim):
    """Once-per-batch K/V projection.  K stays (C, M); V is emitted time-major (H, M, D)."""
    kv = jnp.dot(wkv_ref[...], x2_ref[...],
                 preferred_element_type=jnp.float32) + bkv_ref[...]          # (2C, Mp) f32
    k_ref[...] = kv[:channels, :].astype(jnp.bfloat16)                        # (C, Mp)
    v = kv[channels:, :].reshape(head, head_dim, -1)                          # (H, D, Mp) f32
    # One transpose per batch element (instead of transposing the probability tile
    # every grid step in the attention kernel).
    vt_ref[...] = jnp.transpose(v, (0, 2, 1)).astype(jnp.bfloat16)            # (H, Mp, D)


def _attn_prop_kernel(x1_ref, k_ref, vt_ref, mask_ref,
                      wq_ref, bq_ref, a1_ref, a2_ref, c1_ref, wc2_ref, bc2_ref,
                      out_ref,
                      qt_s, m_s, l_s, acc_s,
                      *, head, head_dim, exp_in_bf16):
    channels = head * head_dim
    mi = pl.program_id(2)
    last_m = pl.num_programs(2) - 1

    # ---- once per (batch, N-tile): project q, cache it transposed; reset accumulators ----
    @pl.when(mi == 0)
    def _init():
        x1b = x1_ref[...].astype(jnp.bfloat16)
        # Wq / bq already carry the 1/sqrt(head_dim) softmax scale (folded host-side).
        q = jnp.dot(wq_ref[...], x1b, preferred_element_type=jnp.float32) + bq_ref[...]
        qt = jnp.transpose(q.reshape(head, head_dim, -1), (0, 2, 1))          # (H, TN, D)
        qt_s[...] = qt.astype(jnp.bfloat16)
        m_s[...] = jnp.full(m_s.shape, -1e30, jnp.float32)
        l_s[...] = jnp.zeros(l_s.shape, jnp.float32)
        acc_s[...] = jnp.zeros(acc_s.shape, jnp.float32)

    # ---- per key chunk: online-softmax update ----
    kh = k_ref[...].reshape(head, head_dim, -1)                               # (H, D, TM) bf16
    # scores[h,n,m] = sum_d qt[h,n,d] * kh[h,d,m]   (MXU-native: LHS lanes vs RHS sublanes)
    scores = lax.dot_general(qt_s[...], kh, (((2,), (1,)), ((0,), (0,))),
                             preferred_element_type=jnp.float32)              # (H, TN, TM) f32
    scores = scores + mask_ref[...][None]                                     # key-padding mask

    m_prev = m_s[...]                                                         # (H, TN, 1)
    m_new = jnp.maximum(m_prev, jnp.max(scores, axis=-1, keepdims=True))
    alpha = jnp.exp(m_prev - m_new)                                           # (H, TN, 1) f32
    s_shift = scores - m_new
    if exp_in_bf16:
        p_mm = jnp.exp(s_shift.astype(jnp.bfloat16))                          # bf16 EUP
        p_sum = jnp.sum(p_mm.astype(jnp.float32), axis=-1, keepdims=True)     # f32 row-sum
    else:
        p32 = jnp.exp(s_shift)                                                # f32 EUP (v5e)
        p_sum = jnp.sum(p32, axis=-1, keepdims=True)
        p_mm = p32.astype(jnp.bfloat16)

    # pv[h,n,d] = sum_m p[h,n,m] * vt[h,m,d]  (MXU-native; no relayout of the p tile)
    pv = lax.dot_general(p_mm, vt_ref[...], (((2,), (1,)), ((0,), (0,))),
                         preferred_element_type=jnp.float32)                  # (H, TN, D) f32

    l_s[...] = alpha * l_s[...] + p_sum
    acc_s[...] = alpha * acc_s[...] + pv
    m_s[...] = m_new

    # ---- once per (batch, N-tile): normalize + fused mh/cat_filter epilogue ----
    @pl.when(mi == last_m)
    def _finalize():
        inv_l = pl.reciprocal(l_s[...], approx=True)                          # EUP, ~free
        av = acc_s[...] * inv_l                                               # (H, TN, D) f32
        add_value = jnp.transpose(av, (0, 2, 1)).reshape(channels, -1)        # (C, TN)
        add_value = add_value.astype(jnp.bfloat16)
        x1 = x1_ref[...]
        x1b = x1.astype(jnp.bfloat16)
        # h1 = relu( bn_scale*(Wc1a@x1 + Wc1b@(Wmh@attn + bmh) + bc1) + bn_shift )
        #    = relu( A1@x1 + A2@attn + c1 )            (all folded host-side)
        h1 = (jnp.dot(a1_ref[...], x1b, preferred_element_type=jnp.float32)
              + jnp.dot(a2_ref[...], add_value, preferred_element_type=jnp.float32)
              + c1_ref[...])
        h1 = jnp.maximum(h1, 0.0).astype(jnp.bfloat16)
        h2 = jnp.dot(wc2_ref[...], h1, preferred_element_type=jnp.float32) + bc2_ref[...]
        out_ref[...] = x1 + h2


# ------------------------------- parameter folding ----------------------------------

def fold_params(raw, head, compute_dtype=jnp.bfloat16):
    """Fold softmax scale, BatchNorm(eval) and mh_filter into the conv weights.

    Returns (wq, bq, wkv, bkv, A1, A2, c1, wc2, bc2): weight matrices in `compute_dtype`,
    biases in f32 (column vectors).
    """
    (wq, bq, wk, bk, wv, bv, wmh, bmh,
     wc1, bc1, gamma, beta, mean, var, eps, wc2, bc2) = raw
    C = wq.shape[0]
    head_dim = C // head
    scale = 1.0 / float(head_dim) ** 0.5

    # 1) softmax 1/sqrt(head_dim) into the query projection
    wq_f = wq * scale
    bq_f = bq * scale

    # 2) stack K and V projections into a single matmul
    wkv = jnp.concatenate([wk, wv], axis=0)            # (2C, C)
    bkv = jnp.concatenate([bk, bv], axis=0)            # (2C,)

    # 3) BatchNorm1d eval: bn(y) = s*y + t; fold mh_filter through cat_filter[0]
    s = gamma / jnp.sqrt(var + eps)
    t = beta - mean * s
    wc1a, wc1b = wc1[:, :C], wc1[:, C:]
    a1 = wc1a * s[:, None]                             # (2C, C)
    a2 = (wc1b @ wmh) * s[:, None]                     # (2C, C)
    c1 = s * (bc1 + wc1b @ bmh) + t                    # (2C,)

    wd = compute_dtype
    return (wq_f.astype(wd), bq_f.reshape(C, 1).astype(jnp.float32),
            wkv.astype(wd), bkv.reshape(2 * C, 1).astype(jnp.float32),
            a1.astype(wd), a2.astype(wd), c1.reshape(2 * C, 1).astype(jnp.float32),
            wc2.astype(wd), bc2.reshape(C, 1).astype(jnp.float32))


# ----------------------------------- wrapper -----------------------------------------

def attention_propagation(x1, x2, params, head, *, tn=128, tm_max=512):
    """AttentionPropagation forward (mode='full', kv_mask=None).

    tn: query tile (128 default; 256-512 is fine on v6e's 128 MiB VMEM).
    tm_max: max key chunk per online-softmax step (bounds the (H,TN,TM) intermediates).
    """
    B, C, N = x1.shape
    B2, C2, M = x2.shape
    assert B == B2 and C == C2 and C % head == 0, "channels must be divisible by head count"
    head_dim = C // head
    # Sublane alignment (f32 tile is 8 rows); small head_dim means the MXU is K-padded,
    # in which case EUP/VPU are the binding units and the flash/exp/KV fixes dominate.
    assert C % 8 == 0 and head_dim % 8 == 0, "channels / head_dim assumed 8-aligned"

    (wq, bq, wkv, bkv, a1, a2, c1, wc2, bc2) = params

    # ---- host-side padding: lane-dense, 128-aligned query and key axes ----
    n_pad = _round_up(max(N, tn), tn)
    m_pad = _round_up(max(M, 128), 128)
    tm = min(tm_max, m_pad)
    while m_pad % tm:
        tm -= 128
    nt, mt = n_pad // tn, m_pad // tm

    x1p = x1 if n_pad == N else jnp.pad(x1, ((0, 0), (0, 0), (0, n_pad - N)))
    x2p = x2 if m_pad == M else jnp.pad(x2, ((0, 0), (0, 0), (0, m_pad - M)))
    x2p = x2p.astype(jnp.bfloat16)          # KV kernel only ever consumes bf16 x2
    # additive key-padding mask: 0 for valid columns, -1e30 for padded ones
    kmask = jnp.where(jnp.arange(m_pad) < M, 0.0, -1e30).astype(jnp.float32).reshape(1, m_pad)

    exp_in_bf16 = _auto_exp_in_bf16()
    vlim = _vmem_limit_bytes()

    # ---- 1) KV projection: once per batch element (not once per N tile) ----
    kv_cost = pl.CostEstimate(
        flops=int(2 * B * (2 * C) * C * m_pad),
        transcendentals=0,
        bytes_accessed=int(B * C * m_pad * 2 + B * 3 * C * m_pad * 2 + 2 * C * C * 2),
    )
    k_all, vt_all = pl.pallas_call(
        partial(_kv_proj_kernel, channels=C, head=head, head_dim=head_dim),
        grid=(B,),
        in_specs=[
            pl.BlockSpec((None, C, m_pad), lambda b: (b, 0, 0)),
            pl.BlockSpec((2 * C, C), lambda b: (0, 0), pipeline_mode=pl.Buffered(1)),
            pl.BlockSpec((2 * C, 1), lambda b: (0, 0), pipeline_mode=pl.Buffered(1)),
        ],
        out_specs=(
            pl.BlockSpec((None, C, m_pad), lambda b: (b, 0, 0)),
            pl.BlockSpec((None, head, m_pad, head_dim), lambda b: (b, 0, 0, 0)),
        ),
        out_shape=(
            jax.ShapeDtypeStruct((B, C, m_pad), jnp.bfloat16),
            jax.ShapeDtypeStruct((B, head, m_pad, head_dim), jnp.bfloat16),
        ),
        compiler_params=pltpu.CompilerParams(
            dimension_semantics=("parallel",), vmem_limit_bytes=vlim),
        cost_estimate=kv_cost,
    )(x2p, wkv, bkv)

    # ---- 2) attention + mh/cat_filter epilogue, flash-style over the key axis ----
    attn_flops = int(B * n_pad * (2 * C * C + 4 * head * head_dim * m_pad + 12 * C * C))
    attn_bytes = int(B * C * n_pad * 4 * 2 + B * C * m_pad * 2
                     + B * head * m_pad * head_dim * 2 + 8 * C * C * 2)
    attn_cost = pl.CostEstimate(flops=attn_flops,
                                transcendentals=int(B * head * n_pad * m_pad),
                                bytes_accessed=attn_bytes)

    def wspec(shape):
        # grid-invariant weights/biases: single-buffered, resident across the whole grid
        return pl.BlockSpec(shape, lambda b, n, m: (0, 0), pipeline_mode=pl.Buffered(1))

    in_specs = [
        pl.BlockSpec((None, C, tn), lambda b, n, m: (b, 0, n)),                   # x1 tile
        pl.BlockSpec((None, C, tm), lambda b, n, m: (b, 0, m)),                   # K chunk
        pl.BlockSpec((None, head, tm, head_dim), lambda b, n, m: (b, 0, m, 0)),   # V^T chunk
        pl.BlockSpec((1, tm), lambda b, n, m: (0, m)),                            # key mask
        wspec((C, C)), wspec((C, 1)),                                             # Wq, bq
        wspec((2 * C, C)), wspec((2 * C, C)), wspec((2 * C, 1)),                  # A1, A2, c1
        wspec((C, 2 * C)), wspec((C, 1)),                                         # Wc2, bc2
    ]
    scratch = [
        pltpu.VMEM((head, tn, head_dim), jnp.bfloat16),   # cached q^T for this (b, n) tile
        pltpu.VMEM((head, tn, 1), jnp.float32),           # running max
        pltpu.VMEM((head, tn, 1), jnp.float32),           # running denominator
        pltpu.VMEM((head, tn, head_dim), jnp.float32),    # running numerator
    ]

    out = pl.pallas_call(
        partial(_attn_prop_kernel, head=head, head_dim=head_dim, exp_in_bf16=exp_in_bf16),
        grid=(B, nt, mt),
        in_specs=in_specs,
        out_specs=pl.BlockSpec((None, C, tn), lambda b, n, m: (b, 0, n)),
        out_shape=jax.ShapeDtypeStruct((B, C, n_pad), jnp.float32),
        scratch_shapes=scratch,
        compiler_params=pltpu.CompilerParams(
            dimension_semantics=("parallel", "parallel", "arbitrary"),
            vmem_limit_bytes=vlim),
        cost_estimate=attn_cost,
    )(x1p, k_all, vt_all, kmask, wq, bq, a1, a2, c1, wc2, bc2)

    return out[:, :, :N] if n_pad != N else out


# ----------------------------- references for validation -----------------------------

def reference_f32(x1, x2, raw, head):
    """Pure-JAX f32 (HIGHEST precision) reference of the original module forward."""
    (wq, bq, wk, bk, wv, bv, wmh, bmh,
     wc1, bc1, gamma, beta, mean, var, eps, wc2, bc2) = raw
    B, C, N = x1.shape
    hd = C // head
    P = lax.Precision.HIGHEST

    def conv(w, b, x):  # (Co,Ci), (Co,), (B,Ci,L) -> (B,Co,L)
        return jnp.einsum('oi,bil->bol', w, x, precision=P) + b[None, :, None]

    q = conv(wq, bq, x1).reshape(B, head, hd, -1)
    k = conv(wk, bk, x2).reshape(B, head, hd, -1)
    v = conv(wv, bv, x2).reshape(B, head, hd, -1)
    qk = jnp.einsum('bhdn,bhdm->bhnm', q, k, precision=P) / (hd ** 0.5)
    score = jax.nn.softmax(qk, axis=-1)
    add_value = jnp.einsum('bhnm,bhdm->bhdn', score, v, precision=P).reshape(B, C, -1)
    add_value = conv(wmh, bmh, add_value)
    cat = jnp.concatenate([x1, add_value], axis=1)
    h = conv(wc1, bc1, cat)
    s = gamma / jnp.sqrt(var + eps)
    t = beta - mean * s
    h = jnp.maximum(h * s[None, :, None] + t[None, :, None], 0.0)
    h = conv(wc2, bc2, h)
    return x1 + h


def reference_folded(x1, x2, params, head, exp_in_bf16):
    """Pure-JAX mirror of the kernel math (folded params, bf16 MXU inputs, bf16/f32 exp)."""
    (wq, bq, wkv, bkv, a1, a2, c1, wc2, bc2) = params
    B, C, N = x1.shape
    hd = C // head

    def mm(w, x):
        return jnp.einsum('oi,bil->bol', w, x.astype(jnp.bfloat16),
                          preferred_element_type=jnp.float32)

    q = mm(wq, x1) + bq[None]
    kv = mm(wkv, x2) + bkv[None]
    k = kv[:, :C].astype(jnp.bfloat16).reshape(B, head, hd, -1)
    vt = jnp.transpose(kv[:, C:].reshape(B, head, hd, -1), (0, 1, 3, 2)).astype(jnp.bfloat16)
    qt = jnp.transpose(q.reshape(B, head, hd, -1), (0, 1, 3, 2)).astype(jnp.bfloat16)
    sc = jnp.einsum('bhnd,bhdm->bhnm', qt, k, preferred_element_type=jnp.float32)
    sc = sc - jnp.max(sc, axis=-1, keepdims=True)
    if exp_in_bf16:
        p = jnp.exp(sc.astype(jnp.bfloat16))
        l = jnp.sum(p.astype(jnp.float32), axis=-1, keepdims=True)
        p_mm = p
    else:
        p32 = jnp.exp(sc)
        l = jnp.sum(p32, axis=-1, keepdims=True)
        p_mm = p32.astype(jnp.bfloat16)
    pv = jnp.einsum('bhnm,bhmd->bhnd', p_mm, vt, preferred_element_type=jnp.float32)
    av = pv / l
    add = jnp.transpose(av, (0, 1, 3, 2)).reshape(B, C, -1).astype(jnp.bfloat16)
    h1 = mm(a1, x1) + jnp.einsum('oi,bil->bol', a2, add,
                                 preferred_element_type=jnp.float32) + c1[None]
    h1 = jnp.maximum(h1, 0.0)
    h2 = mm(wc2, h1) + bc2[None]
    return x1 + h2


if __name__ == "__main__":
    B, C, head = 2, 32, 4
    N, M = 16, 16

    key = jax.random.PRNGKey(0)
    ks = jax.random.split(key, 20)

    def w(k, shape, s=0.1):
        return jax.random.normal(k, shape, dtype=jnp.float32) * s

    x1 = jax.random.normal(ks[0], (B, C, N), dtype=jnp.float32)
    x2 = jax.random.normal(ks[1], (B, C, M), dtype=jnp.float32)

    # Module-style raw parameters (Conv1d kernel_size=1 weights squeezed to 2-D,
    # BatchNorm1d eval-mode running stats + affine params).
    wq, bq = w(ks[2], (C, C)), w(ks[3], (C,))
    wk, bk = w(ks[4], (C, C)), w(ks[5], (C,))
    wv, bv = w(ks[6], (C, C)), w(ks[7], (C,))
    wmh, bmh = w(ks[8], (C, C)), w(ks[9], (C,))
    wc1, bc1 = w(ks[10], (2 * C, 2 * C)), w(ks[11], (2 * C,))
    wc2, bc2 = w(ks[12], (C, 2 * C)), w(ks[13], (C,))
    gamma = 1.0 + w(ks[14], (2 * C,))
    beta = w(ks[15], (2 * C,))
    mean = w(ks[16], (2 * C,))
    var = jnp.abs(w(ks[17], (2 * C,))) + 0.5
    eps = 1e-5

    raw = (wq, bq, wk, bk, wv, bv, wmh, bmh,
           wc1, bc1, gamma, beta, mean, var, eps, wc2, bc2)
    params = fold_params(raw, head)

    out = jax.block_until_ready(attention_propagation(x1, x2, params, head))
    assert out.shape == (B, C, N)
    assert out.dtype == jnp.float32

    # Tight check vs. a pure-JAX mirror of the kernel math (same folding / casts).
    ref_mirror = jax.block_until_ready(
        reference_folded(x1, x2, params, head, _auto_exp_in_bf16()))
    err_m = jnp.max(jnp.abs(out - ref_mirror))
    assert jnp.allclose(out, ref_mirror, atol=5e-3, rtol=5e-3), \
        f"mirror max abs diff {err_m}"

    # Semantics check vs. the original f32 module forward (bf16-level tolerance,
    # since the kernel intentionally feeds the MXU bf16 inputs with f32 accumulation).
    ref = jax.block_until_ready(reference_f32(x1, x2, raw, head))
    err_f = jnp.max(jnp.abs(out - ref))
    assert jnp.allclose(out, ref, atol=2e-2, rtol=2e-2), \
        f"f32-module max abs diff {err_f}"

    print("KERNEL_OK")
</pallas_src>

<mosaic_0001>
module attributes {stable_mosaic.version = 11 : i64} {
  func.func @_kv_proj_kernel(%arg0: i32, %arg1: memref<1x32x128xbf16, #tpu.memory_space<vmem>>, %arg2: memref<64x32xbf16, #tpu.memory_space<vmem>>, %arg3: memref<64x1xf32, #tpu.memory_space<vmem>>, %arg4: memref<1x32x128xbf16, #tpu.memory_space<vmem>>, %arg5: memref<1x4x128x8xbf16, #tpu.memory_space<vmem>>) attributes {dimension_semantics = [#tpu.dimension_semantics<parallel>], iteration_bounds = array<i64: 2>, scalar_prefetch = 0 : i64, scratch_operands = 0 : i64, tpu.core_type = #tpu.core_type<tc>, window_params = [{transform_indices = @transform_0, window_bounds = array<i64: 1, 32, 128>}, {pipeline_mode = #tpu.pipeline_mode<synchronous>, transform_indices = @transform_1, window_bounds = array<i64: 64, 32>}, {pipeline_mode = #tpu.pipeline_mode<synchronous>, transform_indices = @transform_2, window_bounds = array<i64: 64, 1>}, {transform_indices = @transform_3, window_bounds = array<i64: 1, 32, 128>}, {transform_indices = @transform_4, window_bounds = array<i64: 1, 4, 128, 8>}]} {
    %c0 = arith.constant 0 : index
    %c0_0 = arith.constant 0 : index
    %0 = vector.load %arg2[%c0, %c0_0] : memref<64x32xbf16, #tpu.memory_space<vmem>>, vector<64x32xbf16>
    %c0_1 = arith.constant 0 : index
    %c0_2 = arith.constant 0 : index
    %c0_3 = arith.constant 0 : index
    %1 = vector.load %arg1[%c0_1, %c0_2, %c0_3] : memref<1x32x128xbf16, #tpu.memory_space<vmem>>, vector<1x32x128xbf16>
    %2 = vector.shape_cast %1 : vector<1x32x128xbf16> to vector<32x128xbf16>
    %cst = arith.constant dense<0.000000e+00> : vector<64x128xf32>
    %3 = tpu.matmul %0, %2, %cst {dimension_numbers = #tpu.dot_dimension_numbers<[1], [0], [0], [1], [0, 0, 1, 1], [], []>} : vector<64x32xbf16>, vector<32x128xbf16>, vector<64x128xf32> -> vector<64x128xf32>
    %c0_4 = arith.constant 0 : index
    %c0_5 = arith.constant 0 : index
    %4 = vector.load %arg3[%c0_4, %c0_5] : memref<64x1xf32, #tpu.memory_space<vmem>>, vector<64x1xf32>
    %5 = vector.broadcast %4 : vector<64x1xf32> to vector<64x128xf32>
    %6 = arith.addf %3, %5 : vector<64x128xf32>
    %7 = vector.extract_strided_slice %6 {offsets = [0, 0], sizes = [32, 128], strides = [1, 1]} : vector<64x128xf32> to vector<32x128xf32>
    %8 = arith.truncf %7 : vector<32x128xf32> to vector<32x128xbf16>
    %c0_6 = arith.constant 0 : index
    %c0_7 = arith.constant 0 : index
    %c0_8 = arith.constant 0 : index
    %9 = vector.load %arg4[%c0_6, %c0_7, %c0_8] : memref<1x32x128xbf16, #tpu.memory_space<vmem>>, vector<1x32x128xbf16>
    %10 = vector.shape_cast %9 : vector<1x32x128xbf16> to vector<32x128xbf16>
    %11 = vector.shape_cast %8 : vector<32x128xbf16> to vector<1x32x128xbf16>
    tpu.vector_store %arg4[%c0_6, %c0_7, %c0_8], %11 {strides = array<i32>} : memref<1x32x128xbf16, #tpu.memory_space<vmem>>, vector<1x32x128xbf16>,
    %12 = vector.extract_strided_slice %6 {offsets = [32, 0], sizes = [32, 128], strides = [1, 1]} : vector<64x128xf32> to vector<32x128xf32>
    %13 = vector.shape_cast %12 : vector<32x128xf32> to vector<4x8x128xf32>
    %14 = tpu.transpose %13, [0, 2, 1] : vector<4x8x128xf32> -> vector<4x128x8xf32>
    %15 = arith.truncf %14 : vector<4x128x8xf32> to vector<4x128x8xbf16>
    %c0_9 = arith.constant 0 : index
    %c0_10 = arith.constant 0 : index
    %c0_11 = arith.constant 0 : index
    %c0_12 = arith.constant 0 : index
    %16 = vector.load %arg5[%c0_9, %c0_10, %c0_11, %c0_12] : memref<1x4x128x8xbf16, #tpu.memory_space<vmem>>, vector<1x4x128x8xbf16>
    %17 = vector.shape_cast %16 : vector<1x4x128x8xbf16> to vector<4x128x8xbf16>
    %18 = vector.shape_cast %15 : vector<4x128x8xbf16> to vector<1x4x128x8xbf16>
    tpu.vector_store %arg5[%c0_9, %c0_10, %c0_11, %c0_12], %18 {strides = array<i32>} : memref<1x4x128x8xbf16, #tpu.memory_space<vmem>>, vector<1x4x128x8xbf16>,
    return
  }
  func.func @transform_0(%arg0: i32) -> (i32, i32, i32) {
    %c0_i32 = arith.constant 0 : i32
    %c0_i32_0 = arith.constant 0 : i32
    %c0_i32_1 = arith.constant 0 : i32
    return %arg0, %c0_i32, %c0_i32_0 : i32, i32, i32
  }
  func.func @transform_1(%arg0: i32) -> (i32, i32) {
    %c0_i32 = arith.constant 0 : i32
    %c0_i32_0 = arith.constant 0 : i32
    %c0_i32_1 = arith.constant 0 : i32
    return %c0_i32, %c0_i32_0 : i32, i32
  }
  func.func @transform_2(%arg0: i32) -> (i32, i32) {
    %c0_i32 = arith.constant 0 : i32
    %c0_i32_0 = arith.constant 0 : i32
    %c0_i32_1 = arith.constant 0 : i32
    return %c0_i32, %c0_i32_0 : i32, i32
  }
  func.func @transform_3(%arg0: i32) -> (i32, i32, i32) {
    %c0_i32 = arith.constant 0 : i32
    %c0_i32_0 = arith.constant 0 : i32
    %c0_i32_1 = arith.constant 0 : i32
    return %arg0, %c0_i32, %c0_i32_0 : i32, i32, i32
  }
  func.func @transform_4(%arg0: i32) -> (i32, i32, i32, i32) {
    %c0_i32 = arith.constant 0 : i32
    %c0_i32_0 = arith.constant 0 : i32
    %c0_i32_1 = arith.constant 0 : i32
    %c0_i32_2 = arith.constant 0 : i32
    return %arg0, %c0_i32, %c0_i32_0, %c0_i32_1 : i32, i32, i32, i32
  }
}

</mosaic_0001>

<bundles_post_ra>
// kernel: tpu_custom_call.1
= control target key start
LH: loop header
LB: loop body
LE: loop exit
PB: predicated region body
PF: predicated region fallthrough
CT: control target
= control target key end

     0   :  { %10 = vsyncpa [#allocation3], 0  ;;  %s1743_s0 = inlined_call_operand.vmem [shape: bf16[2,32,128], index: 0, kind: input, shape index: {}]   ;;  %s1744_s1 = inlined_call_operand.vmem [shape: bf16[64,32], index: 1, kind: input, shape index: {}]   ;;  %s1745_s2 = inlined_call_operand.vmem [shape: f32[64,1], index: 2, kind: input, shape index: {}]   ;;  %s1746_s3 = inlined_call_operand.hbm [shape: bf16[2,32,128], index: 3, kind: output, shape index: {0}]   ;;  %s1747_s4 = inlined_call_operand.vmem [shape: bf16[2,4,128,8], index: 4, kind: output, shape index: {1}]  }
   0x1   :  { %12 = vsyncpa [#allocation3 + $0x1], 0  ;;  %s1460_s15 = smov 0   ;;  %s1462_s16 = smov 0  }
   0x2   :  { %s1464_s17 = smov 0   ;;  %s1466_s18 = smov 0  }
   0x3 LB: > { %s1481_s19 = sadd.s32 4294967295, %s1429_s18   ;;  %s958_s20 = sadd.s32 4294967294, %s1429_s18   ;;  %s1429_s18 = sphi %s1466_s18, %s1753_s18   ;;  %s1425_s17 = sphi %s1464_s17, %s1752_s17   ;;  %s1421_s16 = sphi %s1462_s16, %s1751_s16   ;;  %s1417_s15 = sphi %s1460_s15, %s1750_s15  }
   0x4   : > { %s1485_s21 = sadd.s32 1, %s1429_s18   ;;  %s93_s22 = sadd.s32 1, %s1425_s17 }
   0x5   : > { %s90_s23 = ssub.s32 %s1429_s18, %s1485_s21  ;;  %p103_p0 = scmp.ne.s32.totalorder %s1425_s17, %s1421_s16 }
   0x6   : > { %p91_p1 = scmp.eq.s32.totalorder %s90_s23, 0  ;;  %p104_p2 = scmp.eq.s32.totalorder %s1481_s19, 1 }
   0x7   : > { %p109_p3 = scmp.ne.s32.totalorder %s1421_s16, %s1417_s15  ;;  %p110_p4 = scmp.eq.s32.totalorder %s958_s20, 1 }
   0x8   : > { %s1496_s24 = scalar_select %p91_p1, %s1425_s17, %s93_s22  }
   0x9   : > { %p1498_p5 = por %p104_p2, %p103_p0  ;;  %p1502_p6 = por %p110_p4, %p109_p3 }
   0xa   : > { %p961_p7 = scmp.ge.s32.totalorder %s1429_s18, 1  ;;  %p168_p8 = scmp.lt.s32.totalorder %s1429_s18, 3 }
   0xc   : > { %p169_p9 = pnand %p961_p7, %p168_p8 }
   0xd   : > { %p199_p10 = scmp.lt.s32.totalorder (!%p169_p9), %s1481_s19, 1  ;;  %s189_s14 = sand.u32 (!%p169_p9), 1, %s1421_s16  }
   0xe   : > { %172 = sbr.rel (%p169_p9) target bundleno = 425 (0x1a9), region = 32  ;;  %s962_s20 = sshll.u32 (!%p169_p9), %s189_s14, 4 }
   0xf   : > { %s191_s22 = scalar_lea.vmem (!%p169_p9), [#allocation2], %s962_s20  ;;  %s1120_s27 = sshll.u32 (!%p169_p9), %s1481_s19, 8 }
  0x10   : > { %s868_s23 = sshll.u32 (!%p169_p9), %s191_s22, 4  ;;  %s1565_s30 = scalar_lea.hbm (!%p169_p9), %s1746_s3, %s1120_s27  ;;  %s1559_s23 = int_to_ptr.vmem [resolvable:$true] %s868_s23 }
  0x11   : > { %s1369_s7 = scalar_lea.vmem (!%p169_p9), %s1559_s23, 256  ;;  %s1432_s8 = smov (!%p169_p9), [#allocation2]  }
  0x12   : > { %p1370_p11 = scmp.ne.s32.totalorder (!%p169_p9), %s1559_s23, %s1369_s7  ;;  %s1373_s9 = sshll.u32 (!%p169_p9), %s1432_s8, 4  ;;  %s1374_s9 = int_to_ptr.vmem [resolvable:$false] %s1373_s9 }
  0x13   : > { %v1365_v0 = vld [vmem:[%s1744_s1] sm:$0xff]   ;;  %vm302_vm0 = vcmask 261120   ;;  %v1366_v1 = vld [vmem:[%s1744_s1 + $0x10] sm:$0xff]   ;;  %s1516_s5 = scalar_select %p199_p10, %s1481_s19, 1  ;;  %v1431_v2 = vmov 0   ;;  %v223_v7 = vld [vmem:[%s1745_s2 + $0x8] sm:$0xff] }
  0x14   : > { %1142 = vmatprep.mubr.msk.bf16.mxu0 %vm302_vm0, %v1365_v0  ;;  %1146 = vmatprep.mubr.msk.bf16.mxu1 %vm302_vm0, %v1366_v1  ;;  %v222_v3 = vld [vmem:[%s1745_s2] sm:$0xff]  ;;  %v224_v4 = vld [vmem:[%s1745_s2 + $0x10] sm:$0xff]  ;;  %v1367_v9 = vld [vmem:[%s1744_s1 + $0x8] sm:$0xff]   ;;  %p1371_p12 = pnand %p1370_p11, %p1498_p5  ;;  %s1375_s10 = scalar_lea.vmem %s1374_s9, 512 }
  0x15   : > { %s1050_s6 = sshll.u32 %s1516_s5, 4  ;;  %1197 = vset.pattern.permute.xlu0 %v1431_v2  ;;  %1198 = vset.pattern.permute.xlu1 %v1431_v2  ;;  %v226_v8 = vld [vmem:[%s1745_s2 + $0x20] sm:$0xff]  ;;  %v1368_v10 = vld [vmem:[%s1744_s1 + $0x18] sm:$0xff]   ;;  %v227_v11 = vld [vmem:[%s1745_s2 + $0x28] sm:$0xff]  ;;  %p1376_p0 = scmp.lt.s32.totalorder %s1559_s23, %s1374_s9 }
  0x16   : > { %s203_s13 = scalar_lea.vmem %s1743_s0, %s1050_s6  ;;  %232 = vperm.xlu0 %1197, %v222_v3   ;;  %242 = vperm.xlu1 %1198, %v224_v4   ;;  %v228_v12 = vld [vmem:[%s1745_s2 + $0x30] sm:$0xff]  ;;  %v229_v13 = vld [vmem:[%s1745_s2 + $0x38] sm:$0xff]  ;;  %s1569_s6 = scalar_lea.sflag [#allocation3], %s189_s14 }
  0x17   : > { %v1363_v5 = vld [vmem:[%s203_s13 + $0x8] sm:$0xff]   ;;  %v1364_v6 = vld [vmem:[%s203_s13] sm:$0xff]   ;;  %v225_v14 = vld [vmem:[%s1745_s2 + $0x18] sm:$0xff]  ;;  %p1372_p13 = pneg %p1371_p12  ;;  %p1377_p1 = scmp.lt.s32.totalorder %s1375_s10, %s1369_s7 }
  0x18   : > { %1138 = vmatprep.subr.bf16.mxu0 %v1363_v5  ;;  %1150 = vmatprep.subr.bf16.mxu1 %v1363_v5 }
  0x19   : > { %1139 = vmatpush3.bf16.msra.mxu0 %v1363_v5  ;;  %1152 = vmatpush3.bf16.msra.mxu1 %v1363_v5  ;;  %p1378_p2 = por %p1377_p1, %p1376_p0 }
  0x1a   : > { %1140 = vmatprep.subr.bf16.mxu0 %v1364_v6  ;;  %1151 = vmatprep.subr.bf16.mxu1 %v1364_v6 }
  0x1b   : > { %237 = vperm.xlu0 %1197, %v223_v7   ;;  %252 = vperm.xlu1 %1198, %v226_v8   ;;  %p1379_p3 = pnand %p1378_p2, %p1372_p13 }
  0x1d   : > { %1141 = vmatpush3.bf16.msra.mxu0 %v1364_v6  ;;  %1153 = vmatpush3.bf16.msra.mxu1 %v1364_v6 }
  0x1f   : > { %257 = vperm.xlu0 %1197, %v227_v11   ;;  %262 = vperm.xlu1 %1198, %v228_v12  }
  0x20   : > { %1143 = vmatmul.mubr.msk.bf16.vlgmr.msra.gmra.mxu0 %vm302_vm0, %v1367_v9  ;;  %1147 = vmatmul.mubr.msk.bf16.vlgmr.msra.gmra.mxu1 %vm302_vm0, %v1368_v10 }
  0x23   : > { %267 = vperm.xlu0 %1197, %v229_v13   ;;  %247 = vperm.xlu1 %1198, %v225_v14  }
  0x91   : > { %v233_v15 = vpop.permute.xlu0 %232  ;;  %v243_v16 = vpop.permute.xlu1 %242 }
  0x96   : > { %v238_v17 = vpop.permute.xlu0 %237  ;;  %v253_v18 = vpop.permute.xlu1 %252 }
  0x9a   : > { %v258_v19 = vpop.permute.xlu0 %257  ;;  %v263_v20 = vpop.permute.xlu1 %262 }
  0x9e   : > { %v268_v25 = vpop.permute.xlu0 %267  ;;  %v248_v26 = vpop.permute.xlu1 %247 }
  0xe0   : > { %v1144_v21 = vpop.f32.mrf.mxu0  ;;  %v1148_v22 = vpop.f32.mrf.mxu1 }
  0xe1   : > { %v358_v29 = vadd.f32 %v1144_v21, %v243_v16  ;;  %v374_v30 = vadd.f32 %v1148_v22, %v263_v20 }
  0xe2   : > { %v349_v23 = vpop.f32.mrf.mxu0  ;;  %v365_v24 = vpop.f32.mrf.mxu1 }
  0xe3   : > { %v350_v33 = vadd.f32 %v349_v23, %v233_v15  ;;  %v366_v34 = vadd.f32 %v365_v24, %v253_v18 }
  0xe4   : > { %v1145_v27 = vpop.f32.mrf.mxu0  ;;  %v1149_v28 = vpop.f32.mrf.mxu1 }
  0xe5   : > { %v361_v31 = vadd.f32 %v1145_v27, %v248_v26  ;;  %v377_v32 = vadd.f32 %v1149_v28, %v268_v25 }
  0xe6   : > { %v352_v35 = vpop.f32.mrf.mxu0  ;;  %v368_v36 = vpop.f32.mrf.mxu1 }
  0xe7   : > { %v1129_v37 = vpack.c.bf16 %v361_v31, %v358_v29  ;;  %v1281_v38 = vpack.i.bf16 %v377_v32, %v374_v30  ;;  %v353_v39 = vadd.f32 %v352_v35, %v238_v17  ;;  %v369_v40 = vadd.f32 %v368_v36, %v258_v19 }
  0xe9   : > { %1131 = vst [vmem:[%s191_s22 + $0x8] sm:$0xff] %v1129_v37   ;;  %v1124_v41 = vpack.c.bf16 %v353_v39, %v350_v33  ;;  %v1199_v42 = vpack.i.bf16 %v369_v40, %v366_v34  ;;  %1282 = vxpose.xlu1.b32.start.end [1/1] (short) %v1281_v38, 128 }
  0xeb   : > { %1125 = vst [vmem:[%s191_s22] sm:$0xff] %v1124_v41   ;;  %1200 = vxpose.xlu0.b32.start.end [1/1] (short) %v1199_v42, 128 }
  0xec   : > { %1382 = shalt.err (!%p1379_p3)
}
  0xed   : > { %s1383_s19 = scalar_lea.hbm %s1565_s30, 256  ;;  %s1387_s13 = scalar_lea.hbm %s1746_s3, 512 }
  0xee   : > { %p1384_p4 = scmp.ne.s32.totalorder %s1565_s30, %s1383_s19  ;;  %p1388_p9 = scmp.lt.s32.totalorder %s1565_s30, %s1746_s3 }
  0xef   : > { %p1389_p10 = scmp.lt.s32.totalorder %s1387_s13, %s1383_s19 }
  0xf0   : > { %p1385_p7 = pnand %p1384_p4, %p1498_p5 }
  0xf1   : > { %p1390_p11 = por %p1389_p10, %p1388_p9 }
  0xf2   : > { %p1386_p8 = pneg %p1385_p7 }
  0xf4   : > { %p1391_p12 = pnand %p1390_p11, %p1386_p8 }
  0xf6   : > { %1394 = shalt.err (!%p1391_p12)
}
  0xf7   : > { %s1433_s22 = smov 64   ;;  %s1434_s27 = smov 4   ;;  %vm784_vm1 = vcmask 60416  }
  0xf8   : > { %1154 = dma.vmem_to_hbm [thread:$0]  (%p1498_p5), %s1559_s23, 256, %s1565_s30, %s1569_s6, %s1433_s22, %s1433_s22, %s1434_s27  }
  0xf9   : > { %s1051_s28 = sshll.u32 %s1516_s5, 8 }
  0xfa   : > { %s1596_s8 = scalar_lea.vmem %s1747_s4, %s1051_s28 }
 0x165   : > { %v1283_v43 = vpop.trf.xlu1 }
 0x166   : > { %v1287_v44 = vunpack.i.h.bf16 %v1283_v43  ;;  %v1284_v45 = vunpack.i.l.bf16 %v1283_v43 }
 0x167   : > { %v1201_v46 = vpop.trf.xlu0 }
 0x168   : > { %v1104_v47 = vpack.c.bf16 %v1287_v44, %v1287_v44  ;;  %v1088_v48 = vpack.c.bf16 %v1284_v45, %v1284_v45  ;;  %v1205_v49 = vunpack.i.h.bf16 %v1201_v46  ;;  %v1202_v50 = vunpack.i.l.bf16 %v1201_v46 }
 0x169   : > { %v1288_v51 = vpop.trf.xlu1 }
 0x16a   : > { %833 = vst.msk [vmem:[%s1596_s8 + $0xc0] sm:$0xf] %vm784_vm1, %v1104_v47  ;;  %817 = vst.msk [vmem:[%s1596_s8 + $0x80] sm:$0xf] %vm784_vm1, %v1088_v48  ;;  %v1072_v52 = vpack.c.bf16 %v1205_v49, %v1205_v49  ;;  %v1292_v53 = vunpack.i.h.bf16 %v1288_v51  ;;  %v1056_v54 = vpack.c.bf16 %v1202_v50, %v1202_v50  ;;  %v1289_v55 = vunpack.i.l.bf16 %v1288_v51 }
 0x16b   : > { %v1206_v56 = vpop.trf.xlu0 }
 0x16c   : > { %801 = vst.msk [vmem:[%s1596_s8 + $0x40] sm:$0xf] %vm784_vm1, %v1072_v52  ;;  %v1105_v57 = vpack.c.bf16 %v1292_v53, %v1292_v53  ;;  %v1210_v58 = vunpack.i.h.bf16 %v1206_v56  ;;  %785 = vst.msk [vmem:[%s1596_s8] sm:$0xf] %vm784_vm1, %v1056_v54  ;;  %v1089_v59 = vpack.c.bf16 %v1289_v55, %v1289_v55  ;;  %v1207_v60 = vunpack.i.l.bf16 %v1206_v56 }
 0x16d   : > { %v1293_v61 = vpop.trf.xlu1 }
 0x16e   : > { %834 = vst.msk [vmem:[%s1596_s8 + $0xc4] sm:$0xf] %vm784_vm1, %v1105_v57  ;;  %v1073_v62 = vpack.c.bf16 %v1210_v58, %v1210_v58  ;;  %v1297_v63 = vunpack.i.h.bf16 %v1293_v61  ;;  %818 = vst.msk [vmem:[%s1596_s8 + $0x84] sm:$0xf] %vm784_vm1, %v1089_v59  ;;  %v1057_v0 = vpack.c.bf16 %v1207_v60, %v1207_v60  ;;  %v1294_v1 = vunpack.i.l.bf16 %v1293_v61 }
 0x16f   : > { %v1211_v2 = vpop.trf.xlu0 }
 0x170   : > { %802 = vst.msk [vmem:[%s1596_s8 + $0x44] sm:$0xf] %vm784_vm1, %v1073_v62  ;;  %v1106_v3 = vpack.c.bf16 %v1297_v63, %v1297_v63  ;;  %v1215_v4 = vunpack.i.h.bf16 %v1211_v2  ;;  %786 = vst.msk [vmem:[%s1596_s8 + $0x4] sm:$0xf] %vm784_vm1, %v1057_v0  ;;  %v1090_v5 = vpack.c.bf16 %v1294_v1, %v1294_v1  ;;  %v1212_v6 = vunpack.i.l.bf16 %v1211_v2 }
 0x171   : > { %v1298_v7 = vpop.trf.xlu1 }
 0x172   : > { %835 = vst.msk [vmem:[%s1596_s8 + $0xc8] sm:$0xf] %vm784_vm1, %v1106_v3  ;;  %v1074_v8 = vpack.c.bf16 %v1215_v4, %v1215_v4  ;;  %v1302_v9 = vunpack.i.h.bf16 %v1298_v7  ;;  %819 = vst.msk [vmem:[%s1596_s8 + $0x88] sm:$0xf] %vm784_vm1, %v1090_v5  ;;  %v1058_v10 = vpack.c.bf16 %v1212_v6, %v1212_v6  ;;  %v1299_v11 = vunpack.i.l.bf16 %v1298_v7 }
 0x173   : > { %v1216_v12 = vpop.trf.xlu0 }
 0x174   : > { %803 = vst.msk [vmem:[%s1596_s8 + $0x48] sm:$0xf] %vm784_vm1, %v1074_v8  ;;  %v1107_v13 = vpack.c.bf16 %v1302_v9, %v1302_v9  ;;  %v1220_v14 = vunpack.i.h.bf16 %v1216_v12  ;;  %787 = vst.msk [vmem:[%s1596_s8 + $0x8] sm:$0xf] %vm784_vm1, %v1058_v10  ;;  %v1091_v15 = vpack.c.bf16 %v1299_v11, %v1299_v11  ;;  %v1217_v16 = vunpack.i.l.bf16 %v1216_v12 }
 0x175   : > { %v1303_v17 = vpop.trf.xlu1 }
 0x176   : > { %836 = vst.msk [vmem:[%s1596_s8 + $0xcc] sm:$0xf] %vm784_vm1, %v1107_v13  ;;  %v1075_v18 = vpack.c.bf16 %v1220_v14, %v1220_v14  ;;  %v1307_v19 = vunpack.i.h.bf16 %v1303_v17  ;;  %820 = vst.msk [vmem:[%s1596_s8 + $0x8c] sm:$0xf] %vm784_vm1, %v1091_v15  ;;  %v1059_v20 = vpack.c.bf16 %v1217_v16, %v1217_v16  ;;  %v1304_v21 = vunpack.i.l.bf16 %v1303_v17 }
 0x177   : > { %v1221_v22 = vpop.trf.xlu0 }
 0x178   : > { %804 = vst.msk [vmem:[%s1596_s8 + $0x4c] sm:$0xf] %vm784_vm1, %v1075_v18  ;;  %v1108_v23 = vpack.c.bf16 %v1307_v19, %v1307_v19  ;;  %v1225_v24 = vunpack.i.h.bf16 %v1221_v22  ;;  %788 = vst.msk [vmem:[%s1596_s8 + $0xc] sm:$0xf] %vm784_vm1, %v1059_v20  ;;  %v1092_v25 = vpack.c.bf16 %v1304_v21, %v1304_v21  ;;  %v1222_v26 = vunpack.i.l.bf16 %v1221_v22 }
 0x179   : > { %v1308_v27 = vpop.trf.xlu1 }
 0x17a   : > { %837 = vst.msk [vmem:[%s1596_s8 + $0xd0] sm:$0xf] %vm784_vm1, %v1108_v23  ;;  %v1076_v28 = vpack.c.bf16 %v1225_v24, %v1225_v24  ;;  %v1312_v29 = vunpack.i.h.bf16 %v1308_v27  ;;  %821 = vst.msk [vmem:[%s1596_s8 + $0x90] sm:$0xf] %vm784_vm1, %v1092_v25  ;;  %v1060_v30 = vpack.c.bf16 %v1222_v26, %v1222_v26  ;;  %v1309_v31 = vunpack.i.l.bf16 %v1308_v27 }
 0x17b   : > { %v1226_v32 = vpop.trf.xlu0 }
 0x17c   : > { %805 = vst.msk [vmem:[%s1596_s8 + $0x50] sm:$0xf] %vm784_vm1, %v1076_v28  ;;  %v1109_v33 = vpack.c.bf16 %v1312_v29, %v1312_v29  ;;  %v1230_v34 = vunpack.i.h.bf16 %v1226_v32  ;;  %789 = vst.msk [vmem:[%s1596_s8 + $0x10] sm:$0xf] %vm784_vm1, %v1060_v30  ;;  %v1093_v35 = vpack.c.bf16 %v1309_v31, %v1309_v31  ;;  %v1227_v36 = vunpack.i.l.bf16 %v1226_v32 }
 0x17d   : > { %v1313_v37 = vpop.trf.xlu1 }
 0x17e   : > { %838 = vst.msk [vmem:[%s1596_s8 + $0xd4] sm:$0xf] %vm784_vm1, %v1109_v33  ;;  %v1077_v38 = vpack.c.bf16 %v1230_v34, %v1230_v34  ;;  %v1317_v39 = vunpack.i.h.bf16 %v1313_v37  ;;  %822 = vst.msk [vmem:[%s1596_s8 + $0x94] sm:$0xf] %vm784_vm1, %v1093_v35  ;;  %v1061_v40 = vpack.c.bf16 %v1227_v36, %v1227_v36  ;;  %v1314_v41 = vunpack.i.l.bf16 %v1313_v37 }
 0x17f   : > { %v1231_v42 = vpop.trf.xlu0 }
 0x180   : > { %806 = vst.msk [vmem:[%s1596_s8 + $0x54] sm:$0xf] %vm784_vm1, %v1077_v38  ;;  %v1110_v43 = vpack.c.bf16 %v1317_v39, %v1317_v39  ;;  %v1235_v44 = vunpack.i.h.bf16 %v1231_v42  ;;  %790 = vst.msk [vmem:[%s1596_s8 + $0x14] sm:$0xf] %vm784_vm1, %v1061_v40  ;;  %v1094_v45 = vpack.c.bf16 %v1314_v41, %v1314_v41  ;;  %v1232_v46 = vunpack.i.l.bf16 %v1231_v42 }
 0x181   : > { %v1318_v47 = vpop.trf.xlu1 }
 0x182   : > { %839 = vst.msk [vmem:[%s1596_s8 + $0xd8] sm:$0xf] %vm784_vm1, %v1110_v43  ;;  %v1078_v48 = vpack.c.bf16 %v1235_v44, %v1235_v44  ;;  %v1322_v49 = vunpack.i.h.bf16 %v1318_v47  ;;  %823 = vst.msk [vmem:[%s1596_s8 + $0x98] sm:$0xf] %vm784_vm1, %v1094_v45  ;;  %v1062_v50 = vpack.c.bf16 %v1232_v46, %v1232_v46  ;;  %v1319_v51 = vunpack.i.l.bf16 %v1318_v47 }
 0x183   : > { %v1236_v52 = vpop.trf.xlu0 }
 0x184   : > { %807 = vst.msk [vmem:[%s1596_s8 + $0x58] sm:$0xf] %vm784_vm1, %v1078_v48  ;;  %v1111_v53 = vpack.c.bf16 %v1322_v49, %v1322_v49  ;;  %v1240_v54 = vunpack.i.h.bf16 %v1236_v52  ;;  %791 = vst.msk [vmem:[%s1596_s8 + $0x18] sm:$0xf] %vm784_vm1, %v1062_v50  ;;  %v1095_v55 = vpack.c.bf16 %v1319_v51, %v1319_v51  ;;  %v1237_v56 = vunpack.i.l.bf16 %v1236_v52 }
 0x185   : > { %v1323_v57 = vpop.trf.xlu1 }
 0x186   : > { %840 = vst.msk [vmem:[%s1596_s8 + $0xdc] sm:$0xf] %vm784_vm1, %v1111_v53  ;;  %v1079_v58 = vpack.c.bf16 %v1240_v54, %v1240_v54  ;;  %v1327_v59 = vunpack.i.h.bf16 %v1323_v57  ;;  %824 = vst.msk [vmem:[%s1596_s8 + $0x9c] sm:$0xf] %vm784_vm1, %v1095_v55  ;;  %v1063_v60 = vpack.c.bf16 %v1237_v56, %v1237_v56  ;;  %v1324_v61 = vunpack.i.l.bf16 %v1323_v57 }
 0x187   : > { %v1241_v62 = vpop.trf.xlu0 }
 0x188   : > { %808 = vst.msk [vmem:[%s1596_s8 + $0x5c] sm:$0xf] %vm784_vm1, %v1079_v58  ;;  %v1112_v63 = vpack.c.bf16 %v1327_v59, %v1327_v59  ;;  %v1245_v0 = vunpack.i.h.bf16 %v1241_v62  ;;  %792 = vst.msk [vmem:[%s1596_s8 + $0x1c] sm:$0xf] %vm784_vm1, %v1063_v60  ;;  %v1096_v1 = vpack.c.bf16 %v1324_v61, %v1324_v61  ;;  %v1242_v2 = vunpack.i.l.bf16 %v1241_v62 }
 0x189   : > { %v1328_v3 = vpop.trf.xlu1 }
 0x18a   : > { %841 = vst.msk [vmem:[%s1596_s8 + $0xe0] sm:$0xf] %vm784_vm1, %v1112_v63  ;;  %v1080_v4 = vpack.c.bf16 %v1245_v0, %v1245_v0  ;;  %v1332_v5 = vunpack.i.h.bf16 %v1328_v3  ;;  %825 = vst.msk [vmem:[%s1596_s8 + $0xa0] sm:$0xf] %vm784_vm1, %v1096_v1  ;;  %v1064_v6 = vpack.c.bf16 %v1242_v2, %v1242_v2  ;;  %v1329_v7 = vunpack.i.l.bf16 %v1328_v3 }
 0x18b   : > { %v1246_v8 = vpop.trf.xlu0 }
 0x18c   : > { %809 = vst.msk [vmem:[%s1596_s8 + $0x60] sm:$0xf] %vm784_vm1, %v1080_v4  ;;  %v1113_v9 = vpack.c.bf16 %v1332_v5, %v1332_v5  ;;  %v1250_v10 = vunpack.i.h.bf16 %v1246_v8  ;;  %793 = vst.msk [vmem:[%s1596_s8 + $0x20] sm:$0xf] %vm784_vm1, %v1064_v6  ;;  %v1097_v11 = vpack.c.bf16 %v1329_v7, %v1329_v7  ;;  %v1247_v12 = vunpack.i.l.bf16 %v1246_v8 }
 0x18d   : > { %v1333_v13 = vpop.trf.xlu1 }
 0x18e   : > { %842 = vst.msk [vmem:[%s1596_s8 + $0xe4] sm:$0xf] %vm784_vm1, %v1113_v9  ;;  %v1081_v14 = vpack.c.bf16 %v1250_v10, %v1250_v10  ;;  %v1337_v15 = vunpack.i.h.bf16 %v1333_v13  ;;  %826 = vst.msk [vmem:[%s1596_s8 + $0xa4] sm:$0xf] %vm784_vm1, %v1097_v11  ;;  %v1065_v16 = vpack.c.bf16 %v1247_v12, %v1247_v12  ;;  %v1334_v17 = vunpack.i.l.bf16 %v1333_v13 }
 0x18f   : > { %v1251_v18 = vpop.trf.xlu0 }
 0x190   : > { %810 = vst.msk [vmem:[%s1596_s8 + $0x64] sm:$0xf] %vm784_vm1, %v1081_v14  ;;  %v1114_v19 = vpack.c.bf16 %v1337_v15, %v1337_v15  ;;  %v1255_v20 = vunpack.i.h.bf16 %v1251_v18  ;;  %794 = vst.msk [vmem:[%s1596_s8 + $0x24] sm:$0xf] %vm784_vm1, %v1065_v16  ;;  %v1098_v21 = vpack.c.bf16 %v1334_v17, %v1334_v17  ;;  %v1252_v22 = vunpack.i.l.bf16 %v1251_v18 }
 0x191   : > { %v1338_v23 = vpop.trf.xlu1 }
 0x192   : > { %843 = vst.msk [vmem:[%s1596_s8 + $0xe8] sm:$0xf] %vm784_vm1, %v1114_v19  ;;  %v1082_v24 = vpack.c.bf16 %v1255_v20, %v1255_v20  ;;  %v1342_v25 = vunpack.i.h.bf16 %v1338_v23  ;;  %827 = vst.msk [vmem:[%s1596_s8 + $0xa8] sm:$0xf] %vm784_vm1, %v1098_v21  ;;  %v1066_v26 = vpack.c.bf16 %v1252_v22, %v1252_v22  ;;  %v1339_v27 = vunpack.i.l.bf16 %v1338_v23 }
 0x193   : > { %v1256_v28 = vpop.trf.xlu0 }
 0x194   : > { %811 = vst.msk [vmem:[%s1596_s8 + $0x68] sm:$0xf] %vm784_vm1, %v1082_v24  ;;  %v1115_v29 = vpack.c.bf16 %v1342_v25, %v1342_v25  ;;  %v1260_v30 = vunpack.i.h.bf16 %v1256_v28  ;;  %795 = vst.msk [vmem:[%s1596_s8 + $0x28] sm:$0xf] %vm784_vm1, %v1066_v26  ;;  %v1099_v31 = vpack.c.bf16 %v1339_v27, %v1339_v27  ;;  %v1257_v32 = vunpack.i.l.bf16 %v1256_v28 }
 0x195   : > { %v1343_v33 = vpop.trf.xlu1 }
 0x196   : > { %844 = vst.msk [vmem:[%s1596_s8 + $0xec] sm:$0xf] %vm784_vm1, %v1115_v29  ;;  %v1083_v34 = vpack.c.bf16 %v1260_v30, %v1260_v30  ;;  %v1347_v35 = vunpack.i.h.bf16 %v1343_v33  ;;  %828 = vst.msk [vmem:[%s1596_s8 + $0xac] sm:$0xf] %vm784_vm1, %v1099_v31  ;;  %v1067_v36 = vpack.c.bf16 %v1257_v32, %v1257_v32  ;;  %v1344_v37 = vunpack.i.l.bf16 %v1343_v33 }
 0x197   : > { %v1261_v38 = vpop.trf.xlu0 }
 0x198   : > { %812 = vst.msk [vmem:[%s1596_s8 + $0x6c] sm:$0xf] %vm784_vm1, %v1083_v34  ;;  %v1116_v39 = vpack.c.bf16 %v1347_v35, %v1347_v35  ;;  %v1265_v40 = vunpack.i.h.bf16 %v1261_v38  ;;  %796 = vst.msk [vmem:[%s1596_s8 + $0x2c] sm:$0xf] %vm784_vm1, %v1067_v36  ;;  %v1100_v41 = vpack.c.bf16 %v1344_v37, %v1344_v37  ;;  %v1262_v42 = vunpack.i.l.bf16 %v1261_v38 }
 0x199   : > { %v1348_v43 = vpop.trf.xlu1 }
 0x19a   : > { %845 = vst.msk [vmem:[%s1596_s8 + $0xf0] sm:$0xf] %vm784_vm1, %v1116_v39  ;;  %v1084_v44 = vpack.c.bf16 %v1265_v40, %v1265_v40  ;;  %v1352_v45 = vunpack.i.h.bf16 %v1348_v43  ;;  %829 = vst.msk [vmem:[%s1596_s8 + $0xb0] sm:$0xf] %vm784_vm1, %v1100_v41  ;;  %v1068_v46 = vpack.c.bf16 %v1262_v42, %v1262_v42  ;;  %v1349_v47 = vunpack.i.l.bf16 %v1348_v43 }
 0x19b   : > { %v1266_v48 = vpop.trf.xlu0 }
 0x19c   : > { %813 = vst.msk [vmem:[%s1596_s8 + $0x70] sm:$0xf] %vm784_vm1, %v1084_v44  ;;  %v1117_v49 = vpack.c.bf16 %v1352_v45, %v1352_v45  ;;  %v1270_v50 = vunpack.i.h.bf16 %v1266_v48  ;;  %797 = vst.msk [vmem:[%s1596_s8 + $0x30] sm:$0xf] %vm784_vm1, %v1068_v46  ;;  %v1101_v51 = vpack.c.bf16 %v1349_v47, %v1349_v47  ;;  %v1267_v52 = vunpack.i.l.bf16 %v1266_v48 }
 0x19d   : > { %v1353_v53 = vpop.trf.xlu1 }
 0x19e   : > { %846 = vst.msk [vmem:[%s1596_s8 + $0xf4] sm:$0xf] %vm784_vm1, %v1117_v49  ;;  %v1085_v54 = vpack.c.bf16 %v1270_v50, %v1270_v50  ;;  %v1357_v55 = vunpack.i.h.bf16 %v1353_v53  ;;  %830 = vst.msk [vmem:[%s1596_s8 + $0xb4] sm:$0xf] %vm784_vm1, %v1101_v51  ;;  %v1069_v56 = vpack.c.bf16 %v1267_v52, %v1267_v52  ;;  %v1354_v57 = vunpack.i.l.bf16 %v1353_v53 }
 0x19f   : > { %v1271_v58 = vpop.trf.xlu0 }
 0x1a0   : > { %814 = vst.msk [vmem:[%s1596_s8 + $0x74] sm:$0xf] %vm784_vm1, %v1085_v54  ;;  %v1118_v59 = vpack.c.bf16 %v1357_v55, %v1357_v55  ;;  %v1275_v60 = vunpack.i.h.bf16 %v1271_v58  ;;  %798 = vst.msk [vmem:[%s1596_s8 + $0x34] sm:$0xf] %vm784_vm1, %v1069_v56  ;;  %v1102_v61 = vpack.c.bf16 %v1354_v57, %v1354_v57  ;;  %v1272_v62 = vunpack.i.l.bf16 %v1271_v58 }
 0x1a1   : > { %v1358_v63 = vpop.trf.xlu1 }
 0x1a2   : > { %847 = vst.msk [vmem:[%s1596_s8 + $0xf8] sm:$0xf] %vm784_vm1, %v1118_v59  ;;  %v1086_v0 = vpack.c.bf16 %v1275_v60, %v1275_v60  ;;  %v1362_v1 = vunpack.i.h.bf16 %v1358_v63  ;;  %831 = vst.msk [vmem:[%s1596_s8 + $0xb8] sm:$0xf] %vm784_vm1, %v1102_v61  ;;  %v1070_v2 = vpack.c.bf16 %v1272_v62, %v1272_v62  ;;  %v1359_v3 = vunpack.i.l.bf16 %v1358_v63 }
 0x1a3   : > { %v1276_v4 = vpop.trf.xlu0 }
 0x1a4   : > { %815 = vst.msk [vmem:[%s1596_s8 + $0x78] sm:$0xf] %vm784_vm1, %v1086_v0  ;;  %v1119_v5 = vpack.c.bf16 %v1362_v1, %v1362_v1  ;;  %v1280_v6 = vunpack.i.h.bf16 %v1276_v4  ;;  %799 = vst.msk [vmem:[%s1596_s8 + $0x38] sm:$0xf] %vm784_vm1, %v1070_v2  ;;  %v1103_v7 = vpack.c.bf16 %v1359_v3, %v1359_v3  ;;  %v1277_v8 = vunpack.i.l.bf16 %v1276_v4 }
 0x1a6   : > { %848 = vst.msk [vmem:[%s1596_s8 + $0xfc] sm:$0xf] %vm784_vm1, %v1119_v5  ;;  %v1087_v9 = vpack.c.bf16 %v1280_v6, %v1280_v6  ;;  %832 = vst.msk [vmem:[%s1596_s8 + $0xbc] sm:$0xf] %vm784_vm1, %v1103_v7  ;;  %v1071_v10 = vpack.c.bf16 %v1277_v8, %v1277_v8 }
 0x1a8   : > { %816 = vst.msk [vmem:[%s1596_s8 + $0x7c] sm:$0xf] %vm784_vm1, %v1087_v9  ;;  %800 = vst.msk [vmem:[%s1596_s8 + $0x3c] sm:$0xf] %vm784_vm1, %v1071_v10 }
 0x1a9 PF: > { %p1160_p5 = scmp.ge.s32.totalorder %s1429_s18, 2  ;;  %s886_s25 = sand.u32 1, %s1417_s15  }
 0x1aa   : > { %s887_s5 = scalar_lea.sflag [#allocation3], %s886_s25 }
 0x1ab   : > { %p1157_p13 = pnand %p1160_p5, %p1502_p6 }
 0x1ad   : > { %p1158_p0 = pneg %p1157_p13 }
 0x1af   : > { %1412 = dma.done.wait (%p1158_p0), %s887_s5, 256  }
 0x1b0   : > { %1414 = vsyncadd (%p1158_p0), %s887_s5, 4294967040  ;;  %p15_p1 = scmp.ge.s32.totalorder %s1485_s21, 4   ;;  %s1750_s15 = smov %s1421_s16 }
 0x1b1   : > { %s1751_s16 = smov %s1425_s17  ;;  %s1752_s17 = smov %s1496_s24 }
 0x1b2   : > { %s1753_s18 = smov %s1485_s21  ;;  %17 = sbr.rel (!%p15_p1) target bundleno = 3 (0x3), region = 79 }
 0x1b7   :  { %900 = vsyncpa [#allocation3], 1 }
 0x1b8   :  { %902 = vsyncpa [#allocation3 + $0x1], 1 }

</bundles_post_ra>
